<compile_context>
chip_gen: v7x
topology: tpu7x:2x2x1
jax: 0.10.0
libtpu: 0.0.40
codegen_flags: <defaults>
</compile_context>

<pallas_src>
import jax
import jax.numpy as jnp
from jax.experimental import pallas as pl
from jax.experimental.pallas import tpu as pltpu


def _decoder_block_kernel(x_ref, w_ref, b_ref, o_ref):
    # x_ref: (1, C, T_HW)   w_ref: (E, C)   b_ref: (E, 1)   o_ref: (1, E, T_HW)
    x = x_ref[0]                                   # (C, T_HW), lane-dense
    w = w_ref[...]                                 # (E, C)
    # out(E, T_HW) = W(E, C) @ x(C, T_HW); K=C is tiny, kernel is HBM-bound,
    # so the matmul is just the cheapest way to express the C-reduction.
    y = jnp.dot(w, x, preferred_element_type=jnp.float32)   # (E, T_HW)
    y = y + b_ref[...]                             # (E,1) broadcast over lanes
    o_ref[0] = y.astype(o_ref.dtype)


def _pick_hw_tile(hw, max_tile=1024):
    """Largest lane-aligned tile (multiple of 128) that divides HW, capped."""
    if hw <= max_tile:
        return hw
    for t in (1024, 896, 768, 640, 512, 384, 256, 128):
        if t <= max_tile and hw % t == 0:
            return t
    return hw  # ragged HW: fall back to a single full block


def mlp_decoder_block(x_nchw, weight, bias):
    """x_nchw: (N, C, H, W); weight: (E, C) (PyTorch Linear layout); bias: (E,)."""
    n, c, h, w = x_nchw.shape
    e = weight.shape[0]
    hw = h * w

    # Free reshapes only — no transposes, no extra HBM traffic.
    x_chw = x_nchw.reshape(n, c, hw)        # (N, C, HW)
    b_e1 = bias.reshape(e, 1)               # (E, 1)

    t_hw = _pick_hw_tile(hw)
    grid = (n, hw // t_hw)

    out_ehw = pl.pallas_call(
        _decoder_block_kernel,
        out_shape=jax.ShapeDtypeStruct((n, e, hw), x_nchw.dtype),
        grid_spec=pltpu.PrefetchScalarGridSpec(
            num_scalar_prefetch=0,
            grid=grid,
            in_specs=[
                pl.BlockSpec((1, c, t_hw), lambda i, j: (i, 0, j)),  # activations
                pl.BlockSpec((e, c), lambda i, j: (0, 0)),           # weight (resident)
                pl.BlockSpec((e, 1), lambda i, j: (0, 0)),           # bias (resident)
            ],
            out_specs=pl.BlockSpec((1, e, t_hw), lambda i, j: (i, 0, j)),
        ),
        compiler_params=pltpu.CompilerParams(
            dimension_semantics=("parallel", "parallel")),
    )(x_chw, weight, b_e1)

    # Free reshape: (N, E, HW) -> (N, E, H, W)
    return out_ehw.reshape(n, e, h, w)


if __name__ == "__main__":
    # Small shapes consistent with the module: N=2, C=input_dim=4, H=W=16, E=embed_dim=32
    N, C, H, W, E = 2, 4, 16, 16, 32

    key = jax.random.PRNGKey(0)
    kx, kw, kb = jax.random.split(key, 3)

    x = jax.random.normal(kx, (N, C, H, W), dtype=jnp.float32)
    # Deterministic synthetic parameters (nn.Linear shapes: W (E, C), b (E,))
    weight = jax.random.normal(kw, (E, C), dtype=jnp.float32) * 0.1
    bias = jax.random.normal(kb, (E,), dtype=jnp.float32) * 0.1

    out = mlp_decoder_block(x, weight, bias)
    out = jax.block_until_ready(out)

    # Reference check in plain JAX (same math as the PyTorch forward).
    # out[n,e,h,w] = sum_c W[e,c] * x[n,c,h,w] + b[e]
    ref = jnp.einsum("nchw,ec->nehw", x, weight) + bias[None, :, None, None]
    assert out.shape == (N, E, H, W)
    assert jnp.allclose(out, ref, atol=1e-4, rtol=1e-4)

    # TODO(synk): self.norm (LayerNorm) is defined in the module but never used
    # in forward(), so it is intentionally not implemented.

    print("KERNEL_OK")
</pallas_src>

<mosaic_0001>
module attributes {stable_mosaic.version = 11 : i64} {
  func.func @_decoder_block_kernel(%arg0: i32, %arg1: i32, %arg2: memref<1x4x256xf32, #tpu.memory_space<vmem>>, %arg3: memref<32x4xf32, #tpu.memory_space<vmem>>, %arg4: memref<32x1xf32, #tpu.memory_space<vmem>>, %arg5: memref<1x32x256xf32, #tpu.memory_space<vmem>>) attributes {dimension_semantics = [#tpu.dimension_semantics<parallel>, #tpu.dimension_semantics<parallel>], iteration_bounds = array<i64: 2, 1>, scalar_prefetch = 0 : i64, scratch_operands = 0 : i64, tpu.core_type = #tpu.core_type<tc>, window_params = [{transform_indices = @transform_0, window_bounds = array<i64: 1, 4, 256>}, {pipeline_mode = #tpu.pipeline_mode<synchronous>, transform_indices = @transform_1, window_bounds = array<i64: 32, 4>}, {pipeline_mode = #tpu.pipeline_mode<synchronous>, transform_indices = @transform_2, window_bounds = array<i64: 32, 1>}, {transform_indices = @transform_3, window_bounds = array<i64: 1, 32, 256>}]} {
    %c0 = arith.constant 0 : index
    %c0_0 = arith.constant 0 : index
    %c0_1 = arith.constant 0 : index
    %0 = vector.load %arg2[%c0, %c0_0, %c0_1] : memref<1x4x256xf32, #tpu.memory_space<vmem>>, vector<1x4x256xf32>
    %1 = vector.shape_cast %0 : vector<1x4x256xf32> to vector<4x256xf32>
    %c0_2 = arith.constant 0 : index
    %c0_3 = arith.constant 0 : index
    %2 = vector.load %arg3[%c0_2, %c0_3] : memref<32x4xf32, #tpu.memory_space<vmem>>, vector<32x4xf32>
    %cst = arith.constant dense<0.000000e+00> : vector<32x256xf32>
    %3 = tpu.matmul %2, %1, %cst {dimension_numbers = #tpu.dot_dimension_numbers<[1], [0], [0], [1], [0, 0, 1, 1], [], []>} : vector<32x4xf32>, vector<4x256xf32>, vector<32x256xf32> -> vector<32x256xf32>
    %c0_4 = arith.constant 0 : index
    %c0_5 = arith.constant 0 : index
    %4 = vector.load %arg4[%c0_4, %c0_5] : memref<32x1xf32, #tpu.memory_space<vmem>>, vector<32x1xf32>
    %5 = vector.broadcast %4 : vector<32x1xf32> to vector<32x256xf32>
    %6 = arith.addf %3, %5 : vector<32x256xf32>
    %c0_6 = arith.constant 0 : index
    %c0_7 = arith.constant 0 : index
    %c0_8 = arith.constant 0 : index
    %7 = vector.load %arg5[%c0_6, %c0_7, %c0_8] : memref<1x32x256xf32, #tpu.memory_space<vmem>>, vector<1x32x256xf32>
    %8 = vector.shape_cast %7 : vector<1x32x256xf32> to vector<32x256xf32>
    %9 = vector.shape_cast %6 : vector<32x256xf32> to vector<1x32x256xf32>
    tpu.vector_store %arg5[%c0_6, %c0_7, %c0_8], %9 {strides = array<i32>} : memref<1x32x256xf32, #tpu.memory_space<vmem>>, vector<1x32x256xf32>,
    return
  }
  func.func @transform_0(%arg0: i32, %arg1: i32) -> (i32, i32, i32) {
    %c0_i32 = arith.constant 0 : i32
    %c0_i32_0 = arith.constant 0 : i32
    return %arg0, %c0_i32, %arg1 : i32, i32, i32
  }
  func.func @transform_1(%arg0: i32, %arg1: i32) -> (i32, i32) {
    %c0_i32 = arith.constant 0 : i32
    %c0_i32_0 = arith.constant 0 : i32
    %c0_i32_1 = arith.constant 0 : i32
    return %c0_i32, %c0_i32_0 : i32, i32
  }
  func.func @transform_2(%arg0: i32, %arg1: i32) -> (i32, i32) {
    %c0_i32 = arith.constant 0 : i32
    %c0_i32_0 = arith.constant 0 : i32
    %c0_i32_1 = arith.constant 0 : i32
    return %c0_i32, %c0_i32_0 : i32, i32
  }
  func.func @transform_3(%arg0: i32, %arg1: i32) -> (i32, i32, i32) {
    %c0_i32 = arith.constant 0 : i32
    %c0_i32_0 = arith.constant 0 : i32
    return %arg0, %c0_i32, %arg1 : i32, i32, i32
  }
}

</mosaic_0001>

<bundles_post_ra>
// kernel: tpu_custom_call.1
= control target key start
LH: loop header
LB: loop body
LE: loop exit
PB: predicated region body
PF: predicated region fallthrough
CT: control target
= control target key end

     0   :  { %8 = vsyncpa [#allocation3], 0  ;;  %s774_s0 = inlined_call_operand.vmem [shape: f32[2,4,256], index: 0, kind: input, shape index: {}]   ;;  %s775_s1 = inlined_call_operand.vmem [shape: f32[32,4], index: 1, kind: input, shape index: {}]   ;;  %s776_s2 = inlined_call_operand.vmem [shape: f32[32,1], index: 2, kind: input, shape index: {}]   ;;  %s777_s3 = inlined_call_operand.hbm [shape: f32[2,32,256], index: 3, kind: output, shape index: {}]  }
   0x1   :  { %10 = vsyncpa [#allocation3 + $0x1], 0  ;;  %s631_s12 = smov 0   ;;  %s633_s13 = smov 0  }
   0x2   :  { %s635_s14 = smov 0   ;;  %s637_s15 = smov 0  }
   0x3   :  { %s639_s16 = smov 0   ;;  %s641_s17 = smov 0  }
   0x4 LB: > { %s441_s18 = sadd.s32 4294967295, %s604_s17   ;;  %s442_s19 = sadd.s32 4294967294, %s604_s17   ;;  %s604_s17 = sphi %s641_s17, %s16_s17   ;;  %s600_s16 = sphi %s639_s16, %s784_s16   ;;  %s596_s15 = sphi %s637_s15, %s783_s15   ;;  %s592_s14 = sphi %s635_s14, %s782_s14   ;;  %s588_s13 = sphi %s633_s13, %s781_s13   ;;  %s584_s12 = sphi %s631_s12, %s780_s12  }
   0x5   : > { %s28_s20 = sadd.s32 1, %s600_s16  ;;  %s107_s21 = sadd.s32 1, %s592_s14 }
   0x6   : > { %p30_p0 = scmp.ge.s32.totalorder %s28_s20, 2  ;;  %p117_p1 = scmp.ne.s32.totalorder %s592_s14, %s588_s13 }
   0x7   : > { %p118_p2 = scmp.eq.s32.totalorder %s441_s18, 1  ;;  %p123_p3 = scmp.ne.s32.totalorder %s588_s13, %s584_s12 }
   0x8   : > { %s786_s20 = smov (%p30_p0, %s28_s20), 0  ;;  %p124_p5 = scmp.eq.s32.totalorder %s442_s19, 1 }
   0x9   : > { %p671_p4 = por %p118_p2, %p117_p1  ;;  %s102_s23 = ssub.s32 %s600_s16, %s786_s20 }
   0xa   : > { %p445_p6 = scmp.ge.s32.totalorder %s604_s17, 1  ;;  %p105_p7 = scmp.eq.s32.totalorder %s102_s23, 0 }
   0xb   : > { %p678_p8 = por %p124_p5, %p123_p3  ;;  %p161_p9 = scmp.lt.s32.totalorder %s604_s17, 3 }
   0xc   : > { %s684_s25 = scalar_select %p105_p7, %s592_s14, %s107_s21  }
   0xd   : > { %p162_p10 = pnand %p445_p6, %p161_p9 }
   0xe   : > { %p190_p11 = scmp.lt.s32.totalorder (!%p162_p10), %s596_s15, 1  ;;  %v606_v0 = vmov (!%p162_p10), 0.0   ;;  %v207_v1 = vld [vmem:[%s776_s2 + $0x10] sm:$0xff] (!%p162_p10)  ;;  %v607_v2 = vmov (!%p162_p10), 0   ;;  %v205_v3 = vld [vmem:[%s776_s2] sm:$0xff] (!%p162_p10)  ;;  %v208_v4 = vld [vmem:[%s776_s2 + $0x18] sm:$0xff] (!%p162_p10) }
   0xf   : > { %165 = sbr.rel (%p162_p10) target bundleno = 265 (0x109), region = 32  ;;  %313 = vmatprep.mubr.f32.mxu0 (!%p162_p10), %v606_v0  ;;  %325 = vmatprep.mubr.f32.mxu1 (!%p162_p10), %v606_v0  ;;  %v206_v5 = vld [vmem:[%s776_s2 + $0x8] sm:$0xff] (!%p162_p10)  ;;  %vm244_vm0 = vcmask (!%p162_p10), 1043456   ;;  %v201_v8 = vld [vmem:[%s775_s1] sm:$0xff] (!%p162_p10)  ;;  %vm231_vm1 = vcmask (!%p162_p10), 31744   ;;  %v203_v9 = vld [vmem:[%s775_s1 + $0x10] sm:$0xff] (!%p162_p10) }
  0x10   : > { %524 = vset.pattern.permute.xlu1 (!%p162_p10), %v607_v2  ;;  %523 = vset.pattern.permute.xlu0 (!%p162_p10), %v607_v2  ;;  %v202_v10 = vld [vmem:[%s775_s1 + $0x8] sm:$0xff] (!%p162_p10)  ;;  %v204_v11 = vld [vmem:[%s775_s1 + $0x18] sm:$0xff] (!%p162_p10)  ;;  %s186_s30 = sand.u32 (!%p162_p10), 1, %s588_s13   ;;  %s461_s5 = sshll.u32 (!%p162_p10), %s596_s15, 10 }
  0x11   : > { %221 = vperm.xlu1 (!%p162_p10), %524, %v207_v1   ;;  %211 = vperm.xlu0 (!%p162_p10), %523, %v205_v3   ;;  %s728_s10 = scalar_lea.sflag (!%p162_p10), [#allocation3], %s186_s30  ;;  %s608_s18 = smov (!%p162_p10), [#allocation2]  }
  0x12   : > { %s530_s19 = sshll.u32 (!%p162_p10), %s608_s18, 4  ;;  %s531_s19 = int_to_ptr.vmem [resolvable:$false] %s530_s19 }
  0x13   : > { %s532_s21 = scalar_lea.vmem (!%p162_p10), %s531_s19, 2048 }
  0x15   : > { %226 = vperm.xlu1 (!%p162_p10), %524, %v208_v4   ;;  %216 = vperm.xlu0 (!%p162_p10), %523, %v206_v5  }
  0x16   : > { %s191_s28 = scalar_select %p190_p11, %s596_s15, 1 }
  0x17   : > { %s722_s15 = scalar_lea.hbm %s777_s3, %s461_s5 }
  0x18   : > { %s460_s4 = sshll.u32 %s191_s28, 3 }
  0x19   : > { %s197_s11 = scalar_lea.vmem %s774_s0, %s460_s4  ;;  %s446_s4 = sshll.u32 %s186_s30, 6 }
  0x1a   : > { %v200_v6 = vld [vmem:[%s197_s11] sm:$0xff]  ;;  %s188_s6 = scalar_lea.vmem [#allocation2], %s446_s4 }
  0x1b   : > { %v230_v7 = vcombine.high %v200_v6, %v200_v6  ;;  %s362_s7 = sshll.u32 %s188_s6, 4  ;;  %s724_s7 = int_to_ptr.vmem [resolvable:$true] %s362_s7 }
  0x1c   : > { %s526_s11 = scalar_lea.vmem %s724_s7, 1024  ;;  %p533_p1 = scmp.lt.s32.totalorder %s724_s7, %s531_s19 }
  0x1d   : > { %449 = vmatprep.subr.msk.mxu0 %vm244_vm0, %v230_v7  ;;  %462 = vmatprep.subr.msk.mxu1 %vm244_vm0, %v230_v7  ;;  %p527_p12 = scmp.ne.s32.totalorder %s724_s7, %s526_s11  ;;  %p534_p2 = scmp.lt.s32.totalorder %s532_s21, %s526_s11 }
  0x1e   : > { %450 = vmatpush1.msk.msra.mxu0 %vm244_vm0, %v200_v6  ;;  %463 = vmatpush1.msk.msra.mxu1 %vm244_vm0, %v200_v6 }
  0x1f   : > { %451 = vmatmul.mubr.msk.f32.vlgmr.msra.gmra.mrb[0].mxu0 %vm231_vm1, %v201_v8  ;;  %453 = vmatmul.mubr.msk.f32.vlgmr.msra.gmra.mrb[0].mxu1 %vm231_vm1, %v203_v9  ;;  %p528_p13 = pnand %p527_p12, %p671_p4  ;;  %p535_p3 = por %p534_p2, %p533_p1 }
  0x20   : > { %319 = vmatprep.mubr.f32.mxu0 %v606_v0  ;;  %331 = vmatprep.mubr.f32.mxu1 %v606_v0 }
  0x21   : > { %p529_p0 = pneg %p528_p13 }
  0x23   : > { %452 = vmatmul.mubr.msk.f32.gmra.mrb[2].mxu0 %vm231_vm1, %v202_v10  ;;  %454 = vmatmul.mubr.msk.f32.gmra.mrb[2].mxu1 %vm231_vm1, %v204_v11  ;;  %p536_p5 = pnand %p535_p3, %p529_p0 }
  0x90   : > { %v222_v12 = vpop.permute.xlu1 %221  ;;  %v212_v13 = vpop.permute.xlu0 %211 }
  0x94   : > { %v227_v22 = vpop.permute.xlu1 %226  ;;  %v217_v23 = vpop.permute.xlu0 %216 }
  0xf2   : > { %v315_v14 = vpop.f32.mrb[0].mxu0  ;;  %v327_v15 = vpop.f32.mrb[0].mxu1 }
  0xf3   : > { %v316_v16 = vadd.f32 %v315_v14, %v212_v13  ;;  %v328_v17 = vadd.f32 %v327_v15, %v222_v12  ;;  %v317_v18 = vpop.f32.mrb[1].mxu0  ;;  %v329_v19 = vpop.f32.mrb[1].mxu1 }
  0xf4   : > { %v318_v20 = vadd.f32 %v317_v18, %v212_v13  ;;  %v330_v21 = vadd.f32 %v329_v19, %v222_v12 }
  0xf5   : > { %338 = vst [vmem:[%s188_s6] sm:$0xff] %v316_v16  ;;  %342 = vst [vmem:[%s188_s6 + $0x20] sm:$0xff] %v328_v17 }
  0xf6   : > { %339 = vst [vmem:[%s188_s6 + $0x8] sm:$0xff] %v318_v20  ;;  %343 = vst [vmem:[%s188_s6 + $0x28] sm:$0xff] %v330_v21  ;;  %v321_v24 = vpop.f32.mrb[2].mxu0  ;;  %v333_v25 = vpop.f32.mrb[2].mxu1 }
  0xf7   : > { %v322_v26 = vadd.f32 %v321_v24, %v217_v23  ;;  %v334_v27 = vadd.f32 %v333_v25, %v227_v22  ;;  %v323_v28 = vpop.f32.mrb[3].mxu0  ;;  %v335_v29 = vpop.f32.mrb[3].mxu1 }
  0xf8   : > { %v324_v30 = vadd.f32 %v323_v28, %v217_v23  ;;  %v336_v31 = vadd.f32 %v335_v29, %v227_v22 }
  0xf9   : > { %340 = vst [vmem:[%s188_s6 + $0x10] sm:$0xff] %v322_v26  ;;  %344 = vst [vmem:[%s188_s6 + $0x30] sm:$0xff] %v334_v27 }
  0xfa   : > { %341 = vst [vmem:[%s188_s6 + $0x18] sm:$0xff] %v324_v30  ;;  %345 = vst [vmem:[%s188_s6 + $0x38] sm:$0xff] %v336_v31 }
  0xfb   : > { %539 = shalt.err (!%p536_p5)
}
  0xfc   : > { %s540_s23 = scalar_lea.hbm %s722_s15, 1024  ;;  %s544_s28 = scalar_lea.hbm %s777_s3, 2048 }
  0xfd   : > { %p541_p6 = scmp.ne.s32.totalorder %s722_s15, %s540_s23  ;;  %p545_p10 = scmp.lt.u32.totalorder %s722_s15, %s777_s3 }
  0xfe   : > { %p546_p11 = scmp.lt.u32.totalorder %s544_s28, %s540_s23  ;;  %p548_p13 = scmp.lt.u32.totalorder %s540_s23, %s722_s15 }
  0xff   : > { %p542_p7 = pnand %p541_p6, %p671_p4 }
 0x100   : > { %p547_p12 = por %p546_p11, %p545_p10 }
 0x101   : > { %p543_p9 = pneg %p542_p7 }
 0x102   : > { %p549_p0 = por %p548_p13, %p547_p12 }
 0x104   : > { %p550_p1 = pnand %p549_p0, %p543_p9 }
 0x106   : > { %553 = shalt.err (!%p550_p1)
}
 0x107   : > { %s609_s4 = smov 256   ;;  %s610_s5 = smov 16  }
 0x108   : > { %464 = dma.vmem_to_hbm [thread:$0]  (%p671_p4), %s724_s7, 1024, %s722_s15, %s728_s10, %s609_s4, %s609_s4, %s610_s5  }
 0x109 PF: > { %p470_p2 = scmp.ge.s32.totalorder %s604_s17, 2  ;;  %s377_s6 = sand.u32 1, %s584_s12  }
 0x10a   : > { %s378_s8 = scalar_lea.sflag [#allocation3], %s377_s6 }
 0x10b   : > { %p467_p3 = pnand %p470_p2, %p678_p8 }
 0x10d   : > { %579 = dma.done.wait (!%p467_p3), %s378_s8, 1024  }
 0x10e   : > { %581 = vsyncadd (!%p467_p3), %s378_s8, 4294966272  ;;  %s16_s17 = sadd.s32 1, %s604_s17   ;;  %s780_s12 = smov %s588_s13 }
 0x10f   : > { %p13_p5 = scmp.ge.s32.totalorder %s16_s17, 4   ;;  %s781_s13 = smov %s592_s14 }
 0x110   : > { %s782_s14 = smov %s684_s25  ;;  %s783_s15 = smov %s600_s16 }
 0x111   : > { %s784_s16 = smov %s786_s20  ;;  %15 = sbr.rel (!%p13_p5) target bundleno = 4 (0x4), region = 67 }
 0x118   :  { %383 = vsyncpa [#allocation3], 1 }
 0x119   :  { %385 = vsyncpa [#allocation3 + $0x1], 1 }

</bundles_post_ra>
